<compile_context>
chip_gen: v6e
topology: v6e:2x2x1
jax: 0.10.0
libtpu: 0.0.40
codegen_flags: <defaults>
</compile_context>

<pallas_src>
import jax
import jax.numpy as jnp
from jax.experimental import pallas as pl
from jax.experimental.pallas import tpu as pltpu


# ----------------------------- kernels --------------------------------------


def _rope_kernel_roll(x_ref, cos_ref, sin_ref, o_ref):
    # x_ref:   (TILE_T, H, D)   (batch dim squeezed out by BlockSpec)
    # cos_ref: (TILE_T, D)  = [cos | cos]
    # sin_ref: (TILE_T, D)  = [sin | -sin]
    x = x_ref[...].astype(jnp.float32)
    d = x_ref.shape[-1]
    # Swap the two halves of the head dim on the XLU (shift == D/2, so rotation
    # direction is irrelevant): roll([x1|x2], D/2) == [x2|x1].
    x_rot = pltpu.roll(x, shift=d // 2, axis=2)
    cos = cos_ref[...].astype(jnp.float32)[:, None, :]   # (TILE_T, 1, D) bcast over H
    sin = sin_ref[...].astype(jnp.float32)[:, None, :]
    o_ref[...] = (x * cos + x_rot * sin).astype(o_ref.dtype)


def _rope_kernel_slice(x_ref, cos_ref, sin_ref, o_ref):
    # Fallback for D % 128 != 0.
    # x_ref: (TILE_T, H, D), cos_ref/sin_ref: (TILE_T, D//2)
    x = x_ref[...].astype(jnp.float32)
    half = x_ref.shape[-1] // 2
    cos = cos_ref[...].astype(jnp.float32)[:, None, :]   # (TILE_T, 1, D//2)
    sin = sin_ref[...].astype(jnp.float32)[:, None, :]
    x1 = x[:, :, :half]
    x2 = x[:, :, half:]
    y1 = x1 * cos + x2 * sin
    y2 = x2 * cos - x1 * sin
    # Single full-width store (one masked vst instead of two sub-tile windows).
    o_ref[...] = jnp.concatenate([y1, y2], axis=-1).astype(o_ref.dtype)


# ----------------------------- tiling helpers --------------------------------


def _vmem_limits():
    """(vmem_limit_bytes, tile_budget_bytes), generation-aware with a safe fallback."""
    cap = None
    try:
        cap = pltpu.get_tpu_info().vmem_capacity_bytes
    except Exception:
        cap = None
    if cap is not None and cap > (64 << 20):
        # v5e / v6e: 128 MiB physical -> raise the scoped limit well past default.
        return 64 << 20, 52 << 20
    # v7x (64 MiB physical) or unknown: stay conservative.
    return 48 << 20, 40 << 20


def _pick_tile_t(T: int, H: int, D: int, itemsize: int, tbl_w: int,
                 budget_bytes: int) -> int:
    """Largest T-tile whose *real* VMEM footprint fits the budget.

    Accounts for (8,128) sublane/lane padding of the (H, D) trailing dims
    (sub-32-bit dtypes pack along sublanes), in+out double buffering, the
    in-kernel float32 temporaries, and the double-buffered table blocks.
    """
    dpad = -(-D // 128) * 128
    sub = 8 * max(1, 4 // max(1, itemsize))       # 8 f32 / 16 bf16 / 32 int8 sublanes
    hpad = -(-H // sub) * sub
    tblpad = -(-tbl_w // 128) * 128
    per_row = (
        2 * 2 * hpad * dpad * itemsize            # x + out blocks, double-buffered
        + 4 * H * dpad * 4                        # in-kernel f32 temps (x, roll, products)
        + 2 * 2 * tblpad * 4                      # cos/sin blocks, double-buffered
    )
    tile = max(1, budget_bytes // per_row)
    tile = min(tile, T)
    if tile >= 8:
        tile -= tile % 8                          # round to sublane-friendly counts
    return int(tile)


# ----------------------------- wrapper ---------------------------------------


def rotary_positional_embedding(x_BTHD, cos_table, sin_table, *,
                                tile_t: int | None = None,
                                donate_x: bool = False):
    """Apply RoPE to x of shape (B, T, H, D).

    If ``cos_table``/``sin_table`` have width D they are treated as the
    pre-widened [cos|cos] / [sin|-sin] tables (lane-dense roll path); width D//2
    selects the slice fallback.  Tables may have >= T rows (no host-side slice).
    """
    B, T, H, D = x_BTHD.shape
    assert D % 4 == 0
    assert cos_table.shape[0] >= T and sin_table.shape[0] >= T

    tbl_w = cos_table.shape[1]
    if tbl_w == D and D % 128 == 0:
        kernel = _rope_kernel_roll
    else:
        assert tbl_w == D // 2, "table width must be D (widened) or D//2"
        kernel = _rope_kernel_slice

    vmem_limit, tile_budget = _vmem_limits()
    if tile_t is None:
        tile_t = _pick_tile_t(T, H, D, x_BTHD.dtype.itemsize, tbl_w, tile_budget)
    n_t = pl.cdiv(T, tile_t)

    return pl.pallas_call(
        kernel,
        out_shape=jax.ShapeDtypeStruct((B, T, H, D), x_BTHD.dtype),
        # Batch innermost: table block index constant across consecutive steps
        # -> tables are not re-DMA'd per batch element.  Large n_t axis outer
        # for an even megacore split on v7x.
        grid=(n_t, B),
        in_specs=[
            pl.BlockSpec((None, tile_t, H, D), lambda t, b: (b, t, 0, 0)),
            pl.BlockSpec((tile_t, tbl_w), lambda t, b: (t, 0)),
            pl.BlockSpec((tile_t, tbl_w), lambda t, b: (t, 0)),
        ],
        out_specs=pl.BlockSpec((None, tile_t, H, D), lambda t, b: (b, t, 0, 0)),
        compiler_params=pltpu.CompilerParams(
            dimension_semantics=("parallel", "parallel"),
            vmem_limit_bytes=vmem_limit,
        ),
        # Optional in-place RoPE (only when the caller is done with x).
        input_output_aliases=({0: 0} if donate_x else {}),
    )(x_BTHD, cos_table, sin_table)


# ----------------------------- module-style wrapper ---------------------------


class RotaryPositionalEmbedding:
    """Mirrors the PyTorch module: buffers built once in __init__, applied in __call__."""

    def __init__(self, dim: int, max_seq_len: int = 2048):
        assert dim % 4 == 0
        n = dim // 4
        angular_freq = (1.0 / 1024.0) ** jnp.linspace(0.0, 1.0, num=n, dtype=jnp.float32)
        angular_freq = jnp.concatenate([angular_freq, jnp.zeros((n,), jnp.float32)])
        t = jnp.arange(max_seq_len, dtype=jnp.float32)
        theta = t[:, None] * angular_freq[None, :]            # (max_seq_len, dim//2)
        self.cos = jnp.cos(theta)                             # PyTorch-equivalent buffers
        self.sin = jnp.sin(theta)
        self.dim = dim
        if dim % 128 == 0:
            # Widen ONCE (not per forward) for the roll formulation.
            self.cos_in = jnp.concatenate([self.cos, self.cos], axis=-1)   # (T, D)
            self.sin_in = jnp.concatenate([self.sin, -self.sin], axis=-1)  # (T, D)
        else:
            self.cos_in, self.sin_in = self.cos, self.sin                  # (T, D//2)

    def __call__(self, x_BTHD, **kwargs):
        assert x_BTHD.shape[-1] == self.dim
        return rotary_positional_embedding(x_BTHD, self.cos_in, self.sin_in, **kwargs)


# ----------------------------- reference / test ------------------------------


def _reference(x_BTHD, cos_table, sin_table):
    # Pure-JAX reference mirroring the PyTorch forward (uses the (T, D//2) tables).
    T = x_BTHD.shape[1]
    cos = cos_table[None, :T, None, :]
    sin = sin_table[None, :T, None, :]
    xf = x_BTHD.astype(jnp.float32)
    half = xf.shape[-1] // 2
    x1, x2 = xf[..., :half], xf[..., half:]
    y1 = x1 * cos + x2 * sin
    y2 = -x1 * sin + x2 * cos
    return jnp.concatenate([y1, y2], axis=-1).astype(x_BTHD.dtype)


if __name__ == "__main__":
    # Case 1: lane-dense head_dim (roll-based kernel path), D % 128 == 0.
    B, T, H, D = 2, 16, 4, 128
    rope = RotaryPositionalEmbedding(D, max_seq_len=32)
    x = jax.random.normal(jax.random.PRNGKey(0), (B, T, H, D), dtype=jnp.float32)
    out = jax.block_until_ready(rope(x))
    ref = _reference(x, rope.cos, rope.sin)
    assert out.shape == x.shape and out.dtype == x.dtype
    assert jnp.allclose(out, ref, atol=1e-5, rtol=1e-5)

    # Case 2: small head_dim (slice fallback path), shapes implied by the module.
    B2, T2, H2, D2 = 2, 8, 4, 32
    rope2 = RotaryPositionalEmbedding(D2, max_seq_len=64)
    x2 = jax.random.normal(jax.random.PRNGKey(0), (B2, T2, H2, D2), dtype=jnp.float32)
    out2 = jax.block_until_ready(rope2(x2))
    ref2 = _reference(x2, rope2.cos, rope2.sin)
    assert out2.shape == x2.shape and out2.dtype == x2.dtype
    assert jnp.allclose(out2, ref2, atol=1e-5, rtol=1e-5)

    print("KERNEL_OK")
</pallas_src>

<mosaic_0001>
module attributes {stable_mosaic.version = 11 : i64} {
  func.func @_rope_kernel_roll(%arg0: i32, %arg1: i32, %arg2: memref<1x16x4x128xf32, #tpu.memory_space<vmem>>, %arg3: memref<16x128xf32, #tpu.memory_space<vmem>>, %arg4: memref<16x128xf32, #tpu.memory_space<vmem>>, %arg5: memref<1x16x4x128xf32, #tpu.memory_space<vmem>>) attributes {dimension_semantics = [#tpu.dimension_semantics<parallel>, #tpu.dimension_semantics<parallel>], iteration_bounds = array<i64: 1, 2>, scalar_prefetch = 0 : i64, scratch_operands = 0 : i64, tpu.core_type = #tpu.core_type<tc>, window_params = [{transform_indices = @transform_0, window_bounds = array<i64: 1, 16, 4, 128>}, {transform_indices = @transform_1, window_bounds = array<i64: 16, 128>}, {transform_indices = @transform_2, window_bounds = array<i64: 16, 128>}, {transform_indices = @transform_3, window_bounds = array<i64: 1, 16, 4, 128>}]} {
    %c0 = arith.constant 0 : index
    %c0_0 = arith.constant 0 : index
    %c0_1 = arith.constant 0 : index
    %c0_2 = arith.constant 0 : index
    %0 = vector.load %arg2[%c0, %c0_0, %c0_1, %c0_2] : memref<1x16x4x128xf32, #tpu.memory_space<vmem>>, vector<1x16x4x128xf32>
    %1 = vector.shape_cast %0 : vector<1x16x4x128xf32> to vector<16x4x128xf32>
    %c64_i32 = arith.constant 64 : i32
    %2 = tpu.dynamic_rotate %1 by %c64_i32 dim 2 : vector<16x4x128xf32>, i32 -> vector<16x4x128xf32>
    %c0_3 = arith.constant 0 : index
    %c0_4 = arith.constant 0 : index
    %3 = vector.load %arg3[%c0_3, %c0_4] : memref<16x128xf32, #tpu.memory_space<vmem>>, vector<16x128xf32>
    %4 = vector.shape_cast %3 : vector<16x128xf32> to vector<16x1x128xf32>
    %c0_5 = arith.constant 0 : index
    %c0_6 = arith.constant 0 : index
    %5 = vector.load %arg4[%c0_5, %c0_6] : memref<16x128xf32, #tpu.memory_space<vmem>>, vector<16x128xf32>
    %6 = vector.shape_cast %5 : vector<16x128xf32> to vector<16x1x128xf32>
    %7 = vector.broadcast %4 : vector<16x1x128xf32> to vector<16x4x128xf32>
    %8 = arith.mulf %1, %7 : vector<16x4x128xf32>
    %9 = vector.broadcast %6 : vector<16x1x128xf32> to vector<16x4x128xf32>
    %10 = arith.mulf %2, %9 : vector<16x4x128xf32>
    %11 = arith.addf %8, %10 : vector<16x4x128xf32>
    %c0_7 = arith.constant 0 : index
    %c0_8 = arith.constant 0 : index
    %c0_9 = arith.constant 0 : index
    %c0_10 = arith.constant 0 : index
    %12 = vector.load %arg5[%c0_7, %c0_8, %c0_9, %c0_10] : memref<1x16x4x128xf32, #tpu.memory_space<vmem>>, vector<1x16x4x128xf32>
    %13 = vector.shape_cast %12 : vector<1x16x4x128xf32> to vector<16x4x128xf32>
    %14 = vector.shape_cast %11 : vector<16x4x128xf32> to vector<1x16x4x128xf32>
    tpu.vector_store %arg5[%c0_7, %c0_8, %c0_9, %c0_10], %14 {strides = array<i32>} : memref<1x16x4x128xf32, #tpu.memory_space<vmem>>, vector<1x16x4x128xf32>,
    return
  }
  func.func @transform_0(%arg0: i32, %arg1: i32) -> (i32, i32, i32, i32) {
    %c0_i32 = arith.constant 0 : i32
    %c0_i32_0 = arith.constant 0 : i32
    %c0_i32_1 = arith.constant 0 : i32
    return %arg1, %arg0, %c0_i32, %c0_i32_0 : i32, i32, i32, i32
  }
  func.func @transform_1(%arg0: i32, %arg1: i32) -> (i32, i32) {
    %c0_i32 = arith.constant 0 : i32
    %c0_i32_0 = arith.constant 0 : i32
    return %arg0, %c0_i32 : i32, i32
  }
  func.func @transform_2(%arg0: i32, %arg1: i32) -> (i32, i32) {
    %c0_i32 = arith.constant 0 : i32
    %c0_i32_0 = arith.constant 0 : i32
    return %arg0, %c0_i32 : i32, i32
  }
  func.func @transform_3(%arg0: i32, %arg1: i32) -> (i32, i32, i32, i32) {
    %c0_i32 = arith.constant 0 : i32
    %c0_i32_0 = arith.constant 0 : i32
    %c0_i32_1 = arith.constant 0 : i32
    return %arg1, %arg0, %c0_i32, %c0_i32_0 : i32, i32, i32, i32
  }
}

</mosaic_0001>

<bundles_post_ra>
// kernel: tpu_custom_call.1
= control target key start
LH: loop header
LB: loop body
LE: loop exit
PB: predicated region body
PF: predicated region fallthrough
CT: control target
= control target key end

     0   :  { %8 = vsyncpa [#allocation3], 0  ;;  %s1546_s0 = inlined_call_operand.hbm [shape: f32[2,16,4,128], index: 0, kind: input, shape index: {}]   ;;  %s1547_s1 = inlined_call_operand.hbm [shape: f32[32,128], index: 1, kind: input, shape index: {}]   ;;  %s1548_s2 = inlined_call_operand.hbm [shape: f32[32,128], index: 2, kind: input, shape index: {}]   ;;  %s1549_s3 = inlined_call_operand.hbm [shape: f32[2,16,4,128], index: 3, kind: output, shape index: {}]  }
   0x1   :  { %10 = vsyncpa [#allocation3 + $0x1], 0 }
   0x2   :  { %11 = vsyncpa [#allocation6], 0 }
   0x3   :  { %12 = vsyncpa [#allocation4], 0 }
   0x4   :  { %14 = vsyncpa [#allocation4 + $0x1], 0  ;;  %s1170_s12 = smov 0   ;;  %s1172_s13 = smov 0  }
   0x5   :  { %s1174_s14 = smov 0   ;;  %s1176_s15 = smov 0  }
   0x6   :  { %s1178_s16 = smov 0   ;;  %s1180_s17 = smov 0  }
   0x7 LB: > { %s858_s18 = sadd.s32 4294967295, %s1137_s17   ;;  %s859_s19 = sadd.s32 4294967294, %s1137_s17   ;;  %s1137_s17 = sphi %s1180_s17, %s20_s17   ;;  %s1133_s16 = sphi %s1178_s16, %s1569_s16   ;;  %s1129_s15 = sphi %s1176_s15, %s1568_s15   ;;  %s1125_s14 = sphi %s1174_s14, %s1567_s14   ;;  %s1121_s13 = sphi %s1172_s13, %s1566_s13   ;;  %s1117_s12 = sphi %s1170_s12, %s1565_s12  }
   0x8   : > { %p54_p0 = scmp.ne.s32.totalorder %s1121_s13, %s1117_s12  ;;  %p1204_p1 = scmp.eq.s32.totalorder %s858_s18, 0 }
   0x9   : > { %p1208_p2 = scmp.eq.s32.totalorder %s858_s18, 1  ;;  %p138_p3 = scmp.eq.s32.totalorder %s859_s19, 1 }
   0xa   : > { %s1553_s20 = scalar_select %p1204_p1, 1, 0 }
   0xb   : > { %p1214_p4 = por %p1204_p1, %p54_p0  ;;  %p860_p5 = scmp.ge.s32.totalorder %s1137_s17, 1 }
   0xc   : > { %p1219_p6 = por %p138_p3, %p54_p0  ;;  %p145_p7 = scmp.lt.s32.totalorder %s1137_s17, 3 }
   0xd   : > { %s1555_s22 = scalar_select %p1214_p4, 1, 0 }
   0xe   : > { %s1556_s23 = scalar_select %p1219_p6, 1, 0 }
   0xf   : > { %p1224_p8 = pnand %p860_p5, %p145_p7  ;;  %s1139_s25 = smov [#allocation5]  }
  0x10   : > { %s160_s26 = sshll.u32 %s1139_s25, 4  ;;  %s1140_s28 = smov [#allocation7]   ;;  %s161_s26 = int_to_ptr.vmem [resolvable:$true] %s160_s26 }
  0x11   : > { %p891_p9 = pneg %p1224_p8  ;;  %s176_s29 = sshll.u32 %s1140_s28, 4  ;;  %s177_s29 = int_to_ptr.vmem [resolvable:$true] %s176_s29 }
  0x12   : > { %s984_s30 = scalar_lea.vmem %s161_s26, 256  ;;  %p992_p5 = scmp.lt.s32.totalorder %s161_s26, %s161_s26 }
  0x13   : > { %p1233_p11 = pnand %p891_p9, %p1204_p1  ;;  %p985_p13 = scmp.ne.s32.totalorder %s161_s26, %s984_s30 }
  0x14   : > { %p993_p7 = scmp.lt.s32.totalorder %s984_s30, %s984_s30 }
  0x15   : > { %p975_p12 = pneg %p1233_p11 }
  0x16   : > { %p994_p10 = por %p993_p7, %p992_p5 }
  0x17   : > { %p987_p0 = pnand %p985_p13, %p975_p12 }
  0x19   : > { %p988_p3 = pneg %p987_p0 }
  0x1b   : > { %p995_p9 = pnand %p994_p10, %p988_p3 }
  0x1d   : > { %998 = shalt.err (!%p995_p9)
}
  0x1e   : > { %s1141_s4 = smov 128   ;;  %s1142_s5 = smov 8  }
  0x1f   : > { %894 = dma.hbm_to_vmem [thread:$0]  (!%p1233_p11), %s1547_s1, 256, %s161_s26, [#allocation6], %s1141_s4, %s1141_s4, %s1142_s5  }
  0x20   : > { %s1010_s8 = scalar_lea.vmem %s177_s29, 256  ;;  %p1018_p1 = scmp.lt.s32.totalorder %s177_s29, %s177_s29 }
  0x21   : > { %p1011_p6 = scmp.ne.s32.totalorder %s177_s29, %s1010_s8  ;;  %p1019_p4 = scmp.lt.s32.totalorder %s1010_s8, %s1010_s8 }
  0x23   : > { %p1013_p13 = pnand %p1011_p6, %p975_p12  ;;  %p1020_p5 = por %p1019_p4, %p1018_p1 }
  0x25   : > { %p1014_p0 = pneg %p1013_p13 }
  0x27   : > { %p1021_p10 = pnand %p1020_p5, %p1014_p0 }
  0x29   : > { %1024 = shalt.err (!%p1021_p10)
}
  0x2a   : > { %897 = dma.hbm_to_vmem [thread:$0]  (!%p1233_p11), %s1548_s2, 256, %s177_s29, [#allocation6], %s1141_s4, %s1141_s4, %s1142_s5  }
  0x2b   : > { %s29_s11 = sadd.s32 1, %s1133_s16  ;;  %s41_s18 = sadd.s32 1, %s1125_s14 }
  0x2c   : > { %p30_p1 = scmp.ge.s32.totalorder %s29_s11, 2  ;;  %p48_p4 = scmp.ne.s32.totalorder %s1125_s14, %s1121_s13 }
  0x2d   : > { %p49_p6 = scmp.eq.s32.totalorder %s1137_s17, 0  ;;  %p908_p12 = scmp.lt.s32.totalorder %s1137_s17, 2 }
  0x2e   : > { %s1571_s11 = smov (%p30_p1, %s29_s11), 0  ;;  %p1265_p7 = por %p1208_p2, %p48_p4 }
  0x2f   : > { %p50_p3 = por %p49_p6, %p48_p4  ;;  %s36_s25 = ssub.s32 %s1133_s16, %s1571_s11 }
  0x30   : > { %s190_s26 = sand.u32 1, %s1125_s14   ;;  %p39_p9 = scmp.eq.s32.totalorder %s36_s25, 0 }
  0x31   : > { %s864_s27 = sshll.u32 %s190_s26, 6  ;;  %s877_s28 = sshll.u32 %s1133_s16, 10 }
  0x32   : > { %s1274_s29 = scalar_select %p39_p9, %s1125_s14, %s41_s18  }
  0x33   : > { %s202_s5 = scalar_lea.hbm %s1546_s0, %s877_s28  ;;  %s194_s6 = scalar_lea.vmem [#allocation2], %s864_s27 }
  0x34   : > { %s203_s7 = sshll.u32 %s194_s6, 4  ;;  %p1281_p11 = pnand %p908_p12, %p50_p3  ;;  %s204_s7 = int_to_ptr.vmem [resolvable:$true] %s203_s7 }
  0x35   : > { %s191_s8 = scalar_lea.sflag [#allocation3], %s190_s26  ;;  %s1038_s9 = scalar_lea.vmem %s204_s7, 1024 }
  0x36   : > { %p1027_p2 = pneg %p1281_p11  ;;  %p1039_p13 = scmp.ne.s32.totalorder %s204_s7, %s1038_s9 }
  0x37   : > { %s1143_s10 = smov [#allocation2]  }
  0x38   : > { %p1041_p0 = pnand %p1039_p13, %p1027_p2  ;;  %s1043_s18 = sshll.u32 %s1143_s10, 4  ;;  %s1044_s18 = int_to_ptr.vmem [resolvable:$false] %s1043_s18 }
  0x39   : > { %s1045_s25 = scalar_lea.vmem %s1044_s18, 2048  ;;  %p1046_p10 = scmp.lt.s32.totalorder %s204_s7, %s1044_s18 }
  0x3a   : > { %p1042_p5 = pneg %p1041_p0  ;;  %p1047_p1 = scmp.lt.s32.totalorder %s1045_s25, %s1038_s9 }
  0x3c   : > { %p1048_p4 = por %p1047_p1, %p1046_p10 }
  0x3e   : > { %p1049_p6 = pnand %p1048_p4, %p1042_p5 }
  0x40   : > { %1052 = shalt.err (!%p1049_p6)
}
  0x41   : > { %s1144_s27 = smov 64   ;;  %s1145_s28 = smov 4  }
  0x42   : > { %901 = dma.hbm_to_vmem [thread:$0]  (!%p1281_p11), %s202_s5, 1024, %s204_s7, %s191_s8, %s1144_s27, %s1144_s27, %s1145_s28  }
  0x43   : > { %215 = sbr.rel (%p1224_p8) target bundleno = 239 (0xef), region = 32  ;;  %s1292_s26 = sand.u32 (!%p1224_p8), 1, %s1121_s13  }
  0x44   : > { %s868_s30 = sshll.u32 (!%p1224_p8), %s1292_s26, 6  ;;  %s218_s4 = scalar_lea.sflag (!%p1224_p8), [#allocation3], %s1292_s26 }
  0x45   : > { %s1298_s6 = scalar_lea.vmem (!%p1224_p8), [#allocation2], %s868_s30  ;;  %p1561_p12 = scmp.ne.s32.totalorder (!%p1224_p8), %s1555_s22, 0 }
  0x48   : > { %1104 = dma.done.wait (%p1561_p12), %s218_s4, 1024  }
  0x49   : > { %1106 = vsyncadd (%p1561_p12), %s218_s4, 4294966272  ;;  %p1562_p3 = scmp.ne.s32.totalorder %s1553_s20, 0 }
  0x4b   : > { %1108 = dma.done.wait (%p1562_p3), [#allocation6], 512  }
  0x4c   : > { %1110 = vsyncadd (%p1562_p3), [#allocation6], 4294966784  ;;  %v1309_v0 = vld [vmem:[%s1298_s6 + $0x8] sm:$0xf]  ;;  %v1312_v1 = vld [vmem:[%s1298_s6] sm:$0xf]  ;;  %v312_v18 = vlaneseq }
  0x4d   : > { %s1146_s22 = smov 64   ;;  %v1319_v2 = vld [vmem:[%s1298_s6 + $0xc] sm:$0xf]  ;;  %v1322_v3 = vld [vmem:[%s1298_s6 + $0x4] sm:$0xf]  ;;  %v406_v23 = vld [vmem:[#allocation7] sm:$0xff] }
  0x4e   : > { %276 = vrot.lane.b32.xlu1 %v1309_v0, %s1146_s22  ;;  %272 = vrot.lane.b32.xlu0 %v1312_v1, %s1146_s22  ;;  %v1329_v4 = vld [vmem:[%s1298_s6 + $0x14] sm:$0xf]  ;;  %v1332_v5 = vld [vmem:[%s1298_s6 + $0x10] sm:$0xf]  ;;  %v1147_v16 = vmov 1966171168   ;;  %v410_v29 = vcombine.high %v406_v23, %v406_v23 }
  0x4f   : > { %v1339_v6 = vld [vmem:[%s1298_s6 + $0x1c] sm:$0xf]  ;;  %v1342_v7 = vld [vmem:[%s1298_s6 + $0x18] sm:$0xf]  ;;  %v1349_v8 = vld [vmem:[%s1298_s6 + $0x24] sm:$0xf]  ;;  %v310_v17 = vunpack.c.l.s4 %v1147_v16 }
  0x50   : > { %v1352_v9 = vld [vmem:[%s1298_s6 + $0x20] sm:$0xf]  ;;  %v1359_v10 = vld [vmem:[%s1298_s6 + $0x2c] sm:$0xf]  ;;  %v1362_v11 = vld [vmem:[%s1298_s6 + $0x28] sm:$0xf] }
  0x51   : > { %v1369_v12 = vld [vmem:[%s1298_s6 + $0x34] sm:$0xf]  ;;  %v1372_v13 = vld [vmem:[%s1298_s6 + $0x30] sm:$0xf]  ;;  %v1379_v14 = vld [vmem:[%s1298_s6 + $0x3c] sm:$0xf]  ;;  %v311_v19 = vunpack.c.0.s8 %v310_v17 }
  0x52   : > { %278 = vrot.lane.b32.xlu1 %v1319_v2, %s1146_s22  ;;  %274 = vrot.lane.b32.xlu0 %v1322_v3, %s1146_s22  ;;  %v1382_v15 = vld [vmem:[%s1298_s6 + $0x38] sm:$0xf]  ;;  %v313_v20 = vshrl.u32 %v312_v18, 7  ;;  %v304_v22 = vld [vmem:[#allocation5] sm:$0xff]  ;;  %v305_v36 = vld [vmem:[#allocation5 + $0x8] sm:$0xff]  ;;  %s1427_s20 = scalar_lea.vmem [#allocation8], %s868_s30 }
  0x53   : > { %v308_v26 = vcombine.high %v304_v22, %v304_v22  ;;  %v357_v52 = vcombine.high %v305_v36, %v305_v36  ;;  %v407_v53 = vld [vmem:[#allocation7 + $0x8] sm:$0xff]  ;;  %s878_s24 = sshll.u32 %s1129_s15, 10  ;;  %s748_s5 = sshll.u32 %s1427_s20, 4  ;;  %s1494_s5 = int_to_ptr.vmem [resolvable:$true] %s748_s5 }
  0x54   : > { %v1388_v21 = vsub.s32 %v311_v19, %v313_v20  ;;  %v1395_v34 = vsub.s32 0, %v313_v20  ;;  %s1492_s8 = scalar_lea.hbm %s1549_s3, %s878_s24  ;;  %s733_s15 = scalar_lea.sflag [#allocation4], %s1292_s26 }
  0x55   : > { %s1053_s9 = scalar_lea.vmem %s1494_s5, 1024  ;;  %s1148_s10 = smov [#allocation8]  }
  0x56   : > { %282 = vrot.lane.b32.xlu1 %v1329_v4, %s1146_s22  ;;  %280 = vrot.lane.b32.xlu0 %v1332_v5, %s1146_s22  ;;  %v315_v24 = vrot.slane %v304_v22, %v1388_v21  ;;  %v417_v25 = vrot.slane %v406_v23, %v1388_v21  ;;  %v322_v32 = vrot.slane %v308_v26, %v1388_v21  ;;  %p1054_p8 = scmp.ne.s32.totalorder %s1494_s5, %s1053_s9  ;;  %s1057_s18 = sshll.u32 %s1148_s10, 4  ;;  %s1058_s18 = int_to_ptr.vmem [resolvable:$false] %s1057_s18 }
  0x57   : > { %v424_v37 = vrot.slane %v410_v29, %v1388_v21  ;;  %v364_v44 = vrot.slane %v305_v36, %v1388_v21  ;;  %s1059_s25 = scalar_lea.vmem %s1058_s18, 2048  ;;  %p1060_p2 = scmp.lt.s32.totalorder %s1494_s5, %s1058_s18 }
  0x58   : > { %v331_v27 = vrot.slane %v315_v24, %v1388_v21  ;;  %v323_v28 = vcombine.high %v315_v24, %v315_v24  ;;  %v433_v30 = vrot.slane %v417_v25, %v1388_v21  ;;  %v425_v31 = vcombine.high %v417_v25, %v417_v25  ;;  %p1055_p9 = pnand %p1054_p8, %p1265_p7  ;;  %p1061_p13 = scmp.lt.s32.totalorder %s1059_s25, %s1053_s9 }
  0x59   : > { %v324_v40 = vcombine.high %v322_v32, %v322_v32  ;;  %v426_v45 = vcombine.high %v424_v37, %v424_v37  ;;  %v338_v51 = vrot.slane %v322_v32, %v1388_v21  ;;  %v372_v57 = vcombine.high %v364_v44, %v364_v44 }
  0x5a   : > { %286 = vrot.lane.b32.xlu1 %v1339_v6, %s1146_s22  ;;  %284 = vrot.lane.b32.xlu0 %v1342_v7, %s1146_s22  ;;  %v353_v33 = vcombine.high %v331_v27, %v331_v27  ;;  %v345_v35 = vrot.slane %v323_v28, %v1388_v21  ;;  %v455_v38 = vcombine.high %v433_v30, %v433_v30  ;;  %p1056_p11 = pneg %p1055_p9  ;;  %p1062_p0 = por %p1061_p13, %p1060_p2 }
  0x5b   : > { %v447_v39 = vrot.slane %v425_v31, %v1388_v21  ;;  %v511_v42 = vrot.slane %v331_v27, %v1395_v34  ;;  %v607_v47 = vrot.slane %v433_v30, %v1395_v34  ;;  %v352_v50 = vrot.slane %v324_v40, %v1388_v21 }
  0x5c   : > { %v519_v41 = vrot.slane %v353_v33, %v1395_v34  ;;  %v355_v43 = vcombine.high %v345_v35, %v345_v35  ;;  %v615_v46 = vrot.slane %v455_v38, %v1395_v34  ;;  %v515_v49 = vrot.slane %v345_v35, %v1395_v34  ;;  %p1063_p5 = pnand %p1062_p0, %p1056_p11 }
  0x5d   : > { %v457_v48 = vcombine.high %v447_v39, %v447_v39  ;;  %v588_v55 = vmul.f32 %v511_v42, %v1312_v1  ;;  %v1412_v58 = vrot.slane %v364_v44, %v1388_v21  ;;  %v611_v61 = vrot.slane %v447_v39, %v1395_v34 }
  0x5e   : > { %290 = vrot.lane.b32.xlu1 %v1349_v8, %s1146_s22  ;;  %288 = vrot.lane.b32.xlu0 %v1352_v9, %s1146_s22  ;;  %v590_v54 = vmul.f32 %v519_v41, %v1309_v0  ;;  %v523_v56 = vrot.slane %v355_v43, %v1395_v34  ;;  %v454_v62 = vrot.slane %v426_v45, %v1388_v21 }
  0x5f   : > { %v440_v63 = vrot.slane %v424_v37, %v1388_v21  ;;  %v619_v0 = vrot.slane %v457_v48, %v1395_v34  ;;  %v466_v1 = vrot.slane %v407_v53, %v1388_v21  ;;  %v589_v18 = vmul.f32 %v515_v49, %v1322_v3 }
  0x60   : > { %v531_v19 = vrot.slane %v352_v50, %v1395_v34  ;;  %v527_v20 = vrot.slane %v338_v51, %v1395_v34  ;;  %v354_v22 = vcombine.high %v338_v51, %v338_v51  ;;  %v591_v23 = vmul.f32 %v523_v56, %v1319_v2 }
  0x61   : > { %v356_v24 = vcombine.high %v352_v50, %v352_v50  ;;  %v627_v29 = vrot.slane %v454_v62, %v1395_v34  ;;  %v623_v30 = vrot.slane %v440_v63, %v1395_v34  ;;  %v456_v31 = vcombine.high %v440_v63, %v440_v63 }
  0x62   : > { %294 = vrot.lane.b32.xlu1 %v1359_v10, %s1146_s22  ;;  %292 = vrot.lane.b32.xlu0 %v1362_v11, %s1146_s22  ;;  %v459_v32 = vcombine.high %v407_v53, %v407_v53  ;;  %v458_v33 = vcombine.high %v454_v62, %v454_v62  ;;  %v474_v35 = vcombine.high %v466_v1, %v466_v1 }
  0x63   : > { %v592_v36 = vmul.f32 %v527_v20, %v1332_v5  ;;  %v535_v37 = vrot.slane %v354_v22, %v1395_v34  ;;  %v394_v38 = vrot.slane %v372_v57, %v1388_v21  ;;  %v371_v39 = vrot.slane %v357_v52, %v1388_v21 }
  0x64   : > { %v593_v40 = vmul.f32 %v531_v19, %v1329_v4  ;;  %v539_v41 = vrot.slane %v356_v24, %v1395_v34  ;;  %v543_v44 = vrot.slane %v1412_v58, %v1395_v34  ;;  %v482_v5 = vrot.slane %v466_v1, %v1388_v21 }
  0x65   : > { %v473_v48 = vrot.slane %v459_v32, %v1388_v21  ;;  %v635_v4 = vrot.slane %v458_v33, %v1395_v34  ;;  %v496_v51 = vrot.slane %v474_v35, %v1388_v21  ;;  %v594_v52 = vmul.f32 %v535_v37, %v1342_v7 }
  0x66   : > { %298 = vrot.lane.b32.xlu1 %v1369_v12, %s1146_s22  ;;  %296 = vrot.lane.b32.xlu0 %v1372_v13, %s1146_s22  ;;  %v547_v53 = vrot.slane %v394_v38, %v1395_v34  ;;  %v595_v56 = vmul.f32 %v539_v41, %v1339_v6  ;;  %v373_v57 = vcombine.high %v371_v39, %v371_v39 }
  0x67   : > { %v639_v63 = vrot.slane %v482_v5, %v1395_v34  ;;  %v643_v1 = vrot.slane %v496_v51, %v1395_v34  ;;  %v387_v20 = vrot.slane %v371_v39, %v1388_v21  ;;  %v596_v22 = vmul.f32 %v543_v44, %v1352_v9 }
  0x68   : > { %v597_v6 = vmul.f32 %v547_v53, %v1349_v8 }
  0x69   : > { %v403_v33 = vcombine.high %v387_v20, %v387_v20 }
  0x6a   : > { %302 = vrot.lane.b32.xlu1 %v1379_v14, %s1146_s22  ;;  %300 = vrot.lane.b32.xlu0 %v1382_v15, %s1146_s22 }
  0xc0   : > { %v277_v59 = vpop.permute.xlu1 %276  ;;  %v273_v60 = vpop.permute.xlu0 %272 }
  0xc1   : > { %v686_v16 = vmul.f32 %v615_v46, %v277_v59  ;;  %v684_v17 = vmul.f32 %v607_v47, %v273_v60  ;;  %v631_v47 = vrot.slane %v456_v31, %v1395_v34 }
  0xc3   : > { %v702_v25 = vadd.f32 %v686_v16, %v590_v54  ;;  %v700_v26 = vadd.f32 %v684_v17, %v588_v55  ;;  %v404_v54 = vcombine.high %v394_v38, %v394_v38  ;;  %v402_v55 = vcombine.high %v1412_v58, %v1412_v58 }
  0xc4   : > { %v279_v27 = vpop.permute.xlu1 %278  ;;  %v275_v28 = vpop.permute.xlu0 %274  ;;  %v504_v16 = vcombine.high %v482_v5, %v482_v5  ;;  %v475_v17 = vcombine.high %v473_v48, %v473_v48  ;;  %v506_v58 = vcombine.high %v496_v51, %v496_v51 }
  0xc5   : > { %718 = vst [vmem:[%s1427_s20 + $0x8] sm:$0xf] %v702_v25  ;;  %716 = vst [vmem:[%s1427_s20] sm:$0xf] %v700_v26  ;;  %v687_v3 = vmul.f32 %v619_v0, %v279_v27  ;;  %v685_v2 = vmul.f32 %v611_v61, %v275_v28  ;;  %v551_v19 = vrot.slane %v402_v55, %v1395_v34 }
  0xc6   : > { %v647_v28 = vrot.slane %v504_v16, %v1395_v34  ;;  %v651_v31 = vrot.slane %v506_v58, %v1395_v34  ;;  %v503_v9 = vrot.slane %v475_v17, %v1388_v21 }
  0xc7   : > { %v703_v42 = vadd.f32 %v687_v3, %v591_v23  ;;  %v701_v43 = vadd.f32 %v685_v2, %v589_v18  ;;  %v555_v18 = vrot.slane %v404_v54, %v1395_v34  ;;  %v401_v23 = vrot.slane %v373_v57, %v1388_v21 }
  0xc8   : > { %v283_v45 = vpop.permute.xlu1 %282  ;;  %v281_v46 = vpop.permute.xlu0 %280  ;;  %v598_v3 = vmul.f32 %v551_v19, %v1362_v11  ;;  %v559_v2 = vrot.slane %v387_v20, %v1395_v34  ;;  %v659_v11 = vrot.slane %v503_v9, %v1395_v34 }
  0xc9   : > { %719 = vst [vmem:[%s1427_s20 + $0xc] sm:$0xf] %v703_v42  ;;  %717 = vst [vmem:[%s1427_s20 + $0x4] sm:$0xf] %v701_v43  ;;  %v689_v49 = vmul.f32 %v627_v29, %v283_v45  ;;  %v688_v50 = vmul.f32 %v623_v30, %v281_v46  ;;  %v489_v29 = vrot.slane %v473_v48, %v1388_v21 }
  0xca   : > { %v599_v32 = vmul.f32 %v555_v18, %v1359_v10  ;;  %v563_v35 = vrot.slane %v401_v23, %v1395_v34  ;;  %v507_v43 = vcombine.high %v503_v9, %v503_v9  ;;  %v600_v44 = vmul.f32 %v559_v2, %v1372_v13 }
  0xcb   : > { %v705_v59 = vadd.f32 %v689_v49, %v593_v40  ;;  %v704_v60 = vadd.f32 %v688_v50, %v592_v36  ;;  %v405_v36 = vcombine.high %v401_v23, %v401_v23  ;;  %v655_v41 = vrot.slane %v489_v29, %v1395_v34 }
  0xcc   : > { %v287_v61 = vpop.permute.xlu1 %286  ;;  %v285_v62 = vpop.permute.xlu0 %284  ;;  %v505_v42 = vcombine.high %v489_v29, %v489_v29  ;;  %v567_v45 = vrot.slane %v403_v33, %v1395_v34  ;;  %v601_v46 = vmul.f32 %v563_v35, %v1369_v12  ;;  %v667_v13 = vrot.slane %v507_v43, %v1395_v34 }
  0xcd   : > { %721 = vst [vmem:[%s1427_s20 + $0x14] sm:$0xf] %v705_v59  ;;  %720 = vst [vmem:[%s1427_s20 + $0x10] sm:$0xf] %v704_v60  ;;  %v691_v7 = vmul.f32 %v635_v4, %v287_v61  ;;  %v690_v0 = vmul.f32 %v631_v47, %v285_v62  ;;  %v571_v47 = vrot.slane %v405_v36, %v1395_v34 }
  0xce   : > { %v602_v53 = vmul.f32 %v567_v45, %v1382_v15 }
  0xcf   : > { %v707_v24 = vadd.f32 %v691_v7, %v595_v56  ;;  %v706_v25 = vadd.f32 %v690_v0, %v594_v52  ;;  %v663_v52 = vrot.slane %v505_v42, %v1395_v34  ;;  %v603_v12 = vmul.f32 %v571_v47, %v1379_v14 }
  0xd0   : > { %v291_v26 = vpop.permute.xlu1 %290  ;;  %v289_v27 = vpop.permute.xlu0 %288 }
  0xd1   : > { %723 = vst [vmem:[%s1427_s20 + $0x1c] sm:$0xf] %v707_v24  ;;  %722 = vst [vmem:[%s1427_s20 + $0x18] sm:$0xf] %v706_v25  ;;  %v693_v8 = vmul.f32 %v643_v1, %v291_v26  ;;  %v692_v30 = vmul.f32 %v639_v63, %v289_v27 }
  0xd3   : > { %v709_v37 = vadd.f32 %v693_v8, %v597_v6  ;;  %v708_v38 = vadd.f32 %v692_v30, %v596_v22 }
  0xd4   : > { %v295_v39 = vpop.permute.xlu1 %294  ;;  %v293_v40 = vpop.permute.xlu0 %292 }
  0xd5   : > { %725 = vst [vmem:[%s1427_s20 + $0x24] sm:$0xf] %v709_v37  ;;  %724 = vst [vmem:[%s1427_s20 + $0x20] sm:$0xf] %v708_v38  ;;  %v695_v10 = vmul.f32 %v651_v31, %v295_v39  ;;  %v694_v21 = vmul.f32 %v647_v28, %v293_v40 }
  0xd7   : > { %v711_v5 = vadd.f32 %v695_v10, %v599_v32  ;;  %v710_v48 = vadd.f32 %v694_v21, %v598_v3 }
  0xd8   : > { %v299_v49 = vpop.permute.xlu1 %298  ;;  %v297_v50 = vpop.permute.xlu0 %296 }
  0xd9   : > { %727 = vst [vmem:[%s1427_s20 + $0x2c] sm:$0xf] %v711_v5  ;;  %726 = vst [vmem:[%s1427_s20 + $0x28] sm:$0xf] %v710_v48  ;;  %v697_v4 = vmul.f32 %v659_v11, %v299_v49  ;;  %v696_v51 = vmul.f32 %v655_v41, %v297_v50 }
  0xdb   : > { %v713_v54 = vadd.f32 %v697_v4, %v601_v46  ;;  %v712_v55 = vadd.f32 %v696_v51, %v600_v44 }
  0xdc   : > { %v303_v56 = vpop.permute.xlu1 %302  ;;  %v301_v57 = vpop.permute.xlu0 %300 }
  0xdd   : > { %729 = vst [vmem:[%s1427_s20 + $0x34] sm:$0xf] %v713_v54  ;;  %728 = vst [vmem:[%s1427_s20 + $0x30] sm:$0xf] %v712_v55  ;;  %v699_v59 = vmul.f32 %v667_v13, %v303_v56  ;;  %v698_v60 = vmul.f32 %v663_v52, %v301_v57 }
  0xdf   : > { %v715_v14 = vadd.f32 %v699_v59, %v603_v12  ;;  %v714_v15 = vadd.f32 %v698_v60, %v602_v53 }
  0xe1   : > { %731 = vst [vmem:[%s1427_s20 + $0x3c] sm:$0xf] %v715_v14  ;;  %730 = vst [vmem:[%s1427_s20 + $0x38] sm:$0xf] %v714_v15 }
  0xe2   : > { %1066 = shalt.err (!%p1063_p5)
}
  0xe3   : > { %s1067_s27 = scalar_lea.hbm %s1492_s8, 1024  ;;  %s1071_s4 = scalar_lea.hbm %s1549_s3, 2048 }
  0xe4   : > { %p1068_p10 = scmp.ne.s32.totalorder %s1492_s8, %s1067_s27  ;;  %p1072_p6 = scmp.lt.s32.totalorder %s1492_s8, %s1549_s3 }
  0xe5   : > { %p1073_p12 = scmp.lt.s32.totalorder %s1071_s4, %s1067_s27 }
  0xe6   : > { %p1069_p1 = pnand %p1068_p10, %p1265_p7 }
  0xe7   : > { %p1074_p3 = por %p1073_p12, %p1072_p6 }
  0xe8   : > { %p1070_p4 = pneg %p1069_p1 }
  0xea   : > { %p1075_p8 = pnand %p1074_p3, %p1070_p4 }
  0xec   : > { %1078 = shalt.err (!%p1075_p8)
}
  0xed   : > { %s1149_s24 = smov 4  }
  0xee   : > { %889 = dma.vmem_to_hbm [thread:$0]  (%p1265_p7), %s1494_s5, 1024, %s1492_s8, %s733_s15, %s1146_s22, %s1146_s22, %s1149_s24  }
  0xef PF: > { %s763_s7 = sand.u32 1, %s1117_s12   ;;  %p1563_p9 = scmp.ne.s32.totalorder %s1556_s23, 0 }
  0xf0   : > { %p1564_p11 = scmp.ge.s32.totalorder %s1137_s17, 2  ;;  %s764_s21 = scalar_lea.sflag [#allocation4], %s763_s7 }
  0xf2   : > { %p903_p2 = pnand %p1564_p11, %p1563_p9 }
  0xf4   : > { %p904_p13 = pneg %p903_p2 }
  0xf6   : > { %1112 = dma.done.wait (%p904_p13), %s764_s21, 1024  }
  0xf7   : > { %1114 = vsyncadd (%p904_p13), %s764_s21, 4294966272  ;;  %s20_s17 = sadd.s32 1, %s1137_s17   ;;  %s1565_s12 = smov %s1121_s13 }
  0xf8   : > { %p17_p0 = scmp.ge.s32.totalorder %s20_s17, 4   ;;  %s1566_s13 = smov %s1125_s14 }
  0xf9   : > { %s1567_s14 = smov %s1274_s29  ;;  %s1568_s15 = smov %s1133_s16 }
  0xfa   : > { %s1569_s16 = smov %s1571_s11  ;;  %19 = sbr.rel (!%p17_p0) target bundleno = 7 (0x7), region = 87 }
  0xff   :  { %769 = vsyncpa [#allocation3], 1 }
 0x100   :  { %771 = vsyncpa [#allocation3 + $0x1], 1 }
 0x101   :  { %772 = vsyncpa [#allocation6], 1 }
 0x102   :  { %773 = vsyncpa [#allocation4], 1 }
 0x103   :  { %775 = vsyncpa [#allocation4 + $0x1], 1 }

</bundles_post_ra>
